<compile_context>
chip_gen: v6e
topology: v6e:2x2x1
jax: 0.10.0
libtpu: 0.0.40
codegen_flags: <defaults>
</compile_context>

<pallas_src>
import jax
import jax.numpy as jnp
from jax.experimental import pallas as pl
from jax.experimental.pallas import tpu as pltpu

N_OUT = 7           # logical number of classes (fc3 out features)
N_OUT_PAD = 8       # padded logits/softmax width inside the kernel
NEG_BIG = -1e30     # padded-logit bias -> exp() == 0 in the softmax


def mlp_kernel(x_ref, w1_ref, b1_ref, w2_ref, b2_ref, w3_ref, b3_ref, o_ref):
    # fc1 + relu (bf16 operands into the MXU, f32 accumulation)
    x = x_ref[...].astype(jnp.bfloat16)
    h1 = jnp.dot(x, w1_ref[...], preferred_element_type=jnp.float32) + b1_ref[...]
    h1 = jnp.maximum(h1, 0.0).astype(jnp.bfloat16)
    # fc2 + relu
    h2 = jnp.dot(h1, w2_ref[...], preferred_element_type=jnp.float32) + b2_ref[...]
    h2 = jnp.maximum(h2, 0.0).astype(jnp.bfloat16)
    # fc3: 8-wide logits; the padded column carries a -1e30 bias so it never
    # wins the max and contributes exactly 0 to the softmax sum.
    logits = jnp.dot(h2, w3_ref[...], preferred_element_type=jnp.float32) + b3_ref[...]
    # numerically stable softmax over the (8-wide) last dim
    m = jnp.max(logits, axis=-1, keepdims=True)
    e = jnp.exp(logits - m)
    s = jnp.sum(e, axis=-1, keepdims=True)
    probs = e * pl.reciprocal(s, approx=True)
    # store only the 7 real classes (masked store; byte-wise 18x cheaper than
    # the old 128-wide lane-dense slab, which dominated HBM traffic)
    o_ref[...] = probs[:, :N_OUT].astype(o_ref.dtype)


def _pick_batch_tile(B: int) -> int:
    """Batch tile: large enough to amortize per-step overhead, >=2 steps when
    there is enough work, and either a multiple of 8 or the full batch."""
    TB_CAP = 4096
    if B <= 512:
        return B                              # single tile (block == full dim is legal)
    if B <= 2 * TB_CAP:
        return (((B + 1) // 2) + 7) // 8 * 8  # two tiles -> pipeline + both v7x TCs
    return TB_CAP


@jax.jit
def mlp_forward(x, params):
    """x: [B, n_inputs] f32. params: PyTorch-equivalent (in,out) weights, (1,out) biases."""
    w1, b1, w2, b2, w3, b3 = params
    B, n_in = x.shape
    h1, h2 = w1.shape[1], w2.shape[1]
    n_out = w3.shape[1]

    # bf16 weights for the MXU; biases stay f32.
    w1b = w1.astype(jnp.bfloat16)
    w2b = w2.astype(jnp.bfloat16)
    # fc3 padded to 8 columns: zero weights, -1e30 bias in the pad column.
    w3p = jnp.zeros((w3.shape[0], N_OUT_PAD), jnp.bfloat16).at[:, :n_out].set(
        w3.astype(jnp.bfloat16))
    b3p = jnp.full((1, N_OUT_PAD), NEG_BIG, jnp.float32).at[:, :n_out].set(b3)

    TB = _pick_batch_tile(B)
    n_blocks = pl.cdiv(B, TB)   # ragged final tile handled by Pallas masking

    const = lambda i: (0, 0)
    flops = 2 * B * (n_in * h1 + h1 * h2 + h2 * N_OUT_PAD)
    bytes_accessed = (
        B * n_in * 4 + B * N_OUT * 4                  # x in (f32), out (f32, 7 cols)
        + (w1b.size + w2b.size + w3p.size) * 2        # bf16 weights (resident)
        + (b1.size + b2.size + b3p.size) * 4          # f32 biases (resident)
    )

    out = pl.pallas_call(
        mlp_kernel,
        out_shape=jax.ShapeDtypeStruct((B, N_OUT), jnp.float32),
        grid=(n_blocks,),
        in_specs=[
            pl.BlockSpec((TB, n_in), lambda i: (i, 0)),      # x: tiled over batch
            pl.BlockSpec((n_in, h1), const),                 # weights/biases: resident
            pl.BlockSpec((1, h1), const),
            pl.BlockSpec((h1, h2), const),
            pl.BlockSpec((1, h2), const),
            pl.BlockSpec((w3.shape[0], N_OUT_PAD), const),
            pl.BlockSpec((1, N_OUT_PAD), const),
        ],
        out_specs=pl.BlockSpec((TB, N_OUT), lambda i: (i, 0)),
        compiler_params=pltpu.CompilerParams(
            dimension_semantics=("parallel",),
        ),
        cost_estimate=pl.CostEstimate(
            flops=flops,
            transcendentals=B * N_OUT_PAD,
            bytes_accessed=bytes_accessed,
        ),
    )(x, w1b, b1, w2b, b2, w3p, b3p)
    return out


def mlp_reference(x, params):
    """Pure-JAX f32 reference of the PyTorch forward."""
    w1, b1, w2, b2, w3, b3 = params
    h = jnp.maximum(x @ w1 + b1, 0.0)
    h = jnp.maximum(h @ w2 + b2, 0.0)
    return jax.nn.softmax(h @ w3 + b3, axis=-1)


def init_params(key, n_inputs):
    # PyTorch Linear init bounds, stored pre-transposed as (in, out) weights
    # and (1, out) biases (2-D for clean TPU broadcast).
    dims = [(n_inputs, 64), (64, 32), (32, N_OUT)]
    keys = jax.random.split(key, 2 * len(dims))
    params = []
    for i, (d_in, d_out) in enumerate(dims):
        bound = 1.0 / (d_in ** 0.5)
        w = jax.random.uniform(keys[2 * i], (d_in, d_out), jnp.float32, -bound, bound)
        b = jax.random.uniform(keys[2 * i + 1], (1, d_out), jnp.float32, -bound, bound)
        params += [w, b]
    return tuple(params)


if __name__ == "__main__":
    n_inputs = 16
    batch = 8
    key = jax.random.PRNGKey(0)
    kx, kp, kx2 = jax.random.split(key, 3)
    params = init_params(kp, n_inputs)

    # Small-shape check (single full block).
    x = jax.random.normal(kx, (batch, n_inputs), dtype=jnp.float32)
    out = mlp_forward(x, params)
    jax.block_until_ready(out)
    assert out.shape == (batch, N_OUT)
    assert jnp.allclose(jnp.sum(out, axis=-1), 1.0, atol=5e-3)
    ref = mlp_reference(x, params)
    assert jnp.allclose(out, ref, atol=3e-2), float(jnp.max(jnp.abs(out - ref)))

    # Multi-block grid + ragged final tile (B=1000 -> TB=504, 2 blocks, 8 masked rows).
    x2 = jax.random.normal(kx2, (1000, n_inputs), dtype=jnp.float32)
    out2 = mlp_forward(x2, params)
    jax.block_until_ready(out2)
    assert out2.shape == (1000, N_OUT)
    assert jnp.allclose(jnp.sum(out2, axis=-1), 1.0, atol=5e-3)
    ref2 = mlp_reference(x2, params)
    assert jnp.allclose(out2, ref2, atol=5e-2), float(jnp.max(jnp.abs(out2 - ref2)))

    print("KERNEL_OK")
</pallas_src>

<mosaic_0001>
module attributes {stable_mosaic.version = 11 : i64} {
  func.func @mlp_kernel(%arg0: i32, %arg1: memref<8x16xf32, #tpu.memory_space<vmem>>, %arg2: memref<16x64xbf16, #tpu.memory_space<vmem>>, %arg3: memref<1x64xf32, #tpu.memory_space<vmem>>, %arg4: memref<64x32xbf16, #tpu.memory_space<vmem>>, %arg5: memref<1x32xf32, #tpu.memory_space<vmem>>, %arg6: memref<32x8xbf16, #tpu.memory_space<vmem>>, %arg7: memref<1x8xf32, #tpu.memory_space<vmem>>, %arg8: memref<8x7xf32, #tpu.memory_space<vmem>>) attributes {dimension_semantics = [#tpu.dimension_semantics<parallel>], iteration_bounds = array<i64: 1>, scalar_prefetch = 0 : i64, scratch_operands = 0 : i64, tpu.core_type = #tpu.core_type<tc>, window_params = [{transform_indices = @transform_0, window_bounds = array<i64: 8, 16>}, {pipeline_mode = #tpu.pipeline_mode<synchronous>, transform_indices = @transform_1, window_bounds = array<i64: 16, 64>}, {pipeline_mode = #tpu.pipeline_mode<synchronous>, transform_indices = @transform_2, window_bounds = array<i64: 1, 64>}, {pipeline_mode = #tpu.pipeline_mode<synchronous>, transform_indices = @transform_3, window_bounds = array<i64: 64, 32>}, {pipeline_mode = #tpu.pipeline_mode<synchronous>, transform_indices = @transform_4, window_bounds = array<i64: 1, 32>}, {pipeline_mode = #tpu.pipeline_mode<synchronous>, transform_indices = @transform_5, window_bounds = array<i64: 32, 8>}, {pipeline_mode = #tpu.pipeline_mode<synchronous>, transform_indices = @transform_6, window_bounds = array<i64: 1, 8>}, {transform_indices = @transform_7, window_bounds = array<i64: 8, 7>}]} {
    %c0 = arith.constant 0 : index
    %c0_0 = arith.constant 0 : index
    %0 = vector.load %arg1[%c0, %c0_0] : memref<8x16xf32, #tpu.memory_space<vmem>>, vector<8x16xf32>
    %1 = arith.truncf %0 : vector<8x16xf32> to vector<8x16xbf16>
    %c0_1 = arith.constant 0 : index
    %c0_2 = arith.constant 0 : index
    %2 = vector.load %arg2[%c0_1, %c0_2] : memref<16x64xbf16, #tpu.memory_space<vmem>>, vector<16x64xbf16>
    %cst = arith.constant dense<0.000000e+00> : vector<8x64xf32>
    %3 = tpu.matmul %1, %2, %cst {dimension_numbers = #tpu.dot_dimension_numbers<[1], [0], [0], [1], [0, 0, 1, 1], [], []>} : vector<8x16xbf16>, vector<16x64xbf16>, vector<8x64xf32> -> vector<8x64xf32>
    %c0_3 = arith.constant 0 : index
    %c0_4 = arith.constant 0 : index
    %4 = vector.load %arg3[%c0_3, %c0_4] : memref<1x64xf32, #tpu.memory_space<vmem>>, vector<1x64xf32>
    %5 = vector.broadcast %4 : vector<1x64xf32> to vector<8x64xf32>
    %6 = arith.addf %3, %5 : vector<8x64xf32>
    %cst_5 = arith.constant 0.000000e+00 : f32
    %7 = vector.broadcast %cst_5 : f32 to vector<8x64xf32>
    %8 = arith.maximumf %6, %7 : vector<8x64xf32>
    %9 = arith.truncf %8 : vector<8x64xf32> to vector<8x64xbf16>
    %c0_6 = arith.constant 0 : index
    %c0_7 = arith.constant 0 : index
    %10 = vector.load %arg4[%c0_6, %c0_7] : memref<64x32xbf16, #tpu.memory_space<vmem>>, vector<64x32xbf16>
    %cst_8 = arith.constant dense<0.000000e+00> : vector<8x32xf32>
    %11 = tpu.matmul %9, %10, %cst_8 {dimension_numbers = #tpu.dot_dimension_numbers<[1], [0], [0], [1], [0, 0, 1, 1], [], []>} : vector<8x64xbf16>, vector<64x32xbf16>, vector<8x32xf32> -> vector<8x32xf32>
    %c0_9 = arith.constant 0 : index
    %c0_10 = arith.constant 0 : index
    %12 = vector.load %arg5[%c0_9, %c0_10] : memref<1x32xf32, #tpu.memory_space<vmem>>, vector<1x32xf32>
    %13 = vector.broadcast %12 : vector<1x32xf32> to vector<8x32xf32>
    %14 = arith.addf %11, %13 : vector<8x32xf32>
    %cst_11 = arith.constant 0.000000e+00 : f32
    %15 = vector.broadcast %cst_11 : f32 to vector<8x32xf32>
    %16 = arith.maximumf %14, %15 : vector<8x32xf32>
    %17 = arith.truncf %16 : vector<8x32xf32> to vector<8x32xbf16>
    %c0_12 = arith.constant 0 : index
    %c0_13 = arith.constant 0 : index
    %18 = vector.load %arg6[%c0_12, %c0_13] : memref<32x8xbf16, #tpu.memory_space<vmem>>, vector<32x8xbf16>
    %cst_14 = arith.constant dense<0.000000e+00> : vector<8x8xf32>
    %19 = tpu.matmul %17, %18, %cst_14 {dimension_numbers = #tpu.dot_dimension_numbers<[1], [0], [0], [1], [0, 0, 1, 1], [], []>} : vector<8x32xbf16>, vector<32x8xbf16>, vector<8x8xf32> -> vector<8x8xf32>
    %c0_15 = arith.constant 0 : index
    %c0_16 = arith.constant 0 : index
    %20 = vector.load %arg7[%c0_15, %c0_16] : memref<1x8xf32, #tpu.memory_space<vmem>>, vector<1x8xf32>
    %21 = vector.broadcast %20 : vector<1x8xf32> to vector<8x8xf32>
    %22 = arith.addf %19, %21 : vector<8x8xf32>
    %cst_17 = arith.constant dense<0xFF800000> : vector<8xf32>
    %23 = vector.multi_reduction <maximumf>, %22, %cst_17 [1] : vector<8x8xf32> to vector<8xf32>
    %24 = vector.shape_cast %23 : vector<8xf32> to vector<8x1xf32>
    %25 = vector.broadcast %24 : vector<8x1xf32> to vector<8x8xf32>
    %26 = arith.subf %22, %25 : vector<8x8xf32>
    %27 = math.exp %26 : vector<8x8xf32>
    %cst_18 = arith.constant dense<0.000000e+00> : vector<8xf32>
    %28 = vector.multi_reduction <add>, %27, %cst_18 [1] : vector<8x8xf32> to vector<8xf32>
    %29 = vector.shape_cast %28 : vector<8xf32> to vector<8x1xf32>
    %30 = tpu.reciprocal %29 {approx = true} : vector<8x1xf32> -> vector<8x1xf32>
    %31 = vector.broadcast %30 : vector<8x1xf32> to vector<8x8xf32>
    %32 = arith.mulf %27, %31 : vector<8x8xf32>
    %33 = vector.extract_strided_slice %32 {offsets = [0, 0], sizes = [8, 7], strides = [1, 1]} : vector<8x8xf32> to vector<8x7xf32>
    %c0_19 = arith.constant 0 : index
    %c0_20 = arith.constant 0 : index
    %34 = vector.load %arg8[%c0_19, %c0_20] : memref<8x7xf32, #tpu.memory_space<vmem>>, vector<8x7xf32>
    tpu.vector_store %arg8[%c0_19, %c0_20], %33 {strides = array<i32>} : memref<8x7xf32, #tpu.memory_space<vmem>>, vector<8x7xf32>,
    return
  }
  func.func @transform_0(%arg0: i32) -> (i32, i32) {
    %c0_i32 = arith.constant 0 : i32
    %c0_i32_0 = arith.constant 0 : i32
    return %arg0, %c0_i32 : i32, i32
  }
  func.func @transform_1(%arg0: i32) -> (i32, i32) {
    %c0_i32 = arith.constant 0 : i32
    %c0_i32_0 = arith.constant 0 : i32
    %c0_i32_1 = arith.constant 0 : i32
    return %c0_i32, %c0_i32_0 : i32, i32
  }
  func.func @transform_2(%arg0: i32) -> (i32, i32) {
    %c0_i32 = arith.constant 0 : i32
    %c0_i32_0 = arith.constant 0 : i32
    %c0_i32_1 = arith.constant 0 : i32
    return %c0_i32, %c0_i32_0 : i32, i32
  }
  func.func @transform_3(%arg0: i32) -> (i32, i32) {
    %c0_i32 = arith.constant 0 : i32
    %c0_i32_0 = arith.constant 0 : i32
    %c0_i32_1 = arith.constant 0 : i32
    return %c0_i32, %c0_i32_0 : i32, i32
  }
  func.func @transform_4(%arg0: i32) -> (i32, i32) {
    %c0_i32 = arith.constant 0 : i32
    %c0_i32_0 = arith.constant 0 : i32
    %c0_i32_1 = arith.constant 0 : i32
    return %c0_i32, %c0_i32_0 : i32, i32
  }
  func.func @transform_5(%arg0: i32) -> (i32, i32) {
    %c0_i32 = arith.constant 0 : i32
    %c0_i32_0 = arith.constant 0 : i32
    %c0_i32_1 = arith.constant 0 : i32
    return %c0_i32, %c0_i32_0 : i32, i32
  }
  func.func @transform_6(%arg0: i32) -> (i32, i32) {
    %c0_i32 = arith.constant 0 : i32
    %c0_i32_0 = arith.constant 0 : i32
    %c0_i32_1 = arith.constant 0 : i32
    return %c0_i32, %c0_i32_0 : i32, i32
  }
  func.func @transform_7(%arg0: i32) -> (i32, i32) {
    %c0_i32 = arith.constant 0 : i32
    %c0_i32_0 = arith.constant 0 : i32
    return %arg0, %c0_i32 : i32, i32
  }
}

</mosaic_0001>

<bundles_post_ra>
// kernel: mlp_forward.1
= control target key start
LH: loop header
LB: loop body
LE: loop exit
PB: predicated region body
PF: predicated region fallthrough
CT: control target
= control target key end

     0   :  { %v356_v1 = vmov 0.0   ;;  %vm45_vm0 = vcmask 130048   ;;  %vm357_vm1 = vmmov 0   ;;  %s435_s0 = inlined_call_operand.vmem [shape: f32[8,16], index: 0, kind: input, shape index: {}]   ;;  %s436_s1 = inlined_call_operand.vmem [shape: bf16[16,64], index: 1, kind: input, shape index: {}]   ;;  %s437_s2 = inlined_call_operand.vmem [shape: f32[1,64], index: 2, kind: input, shape index: {}]   ;;  %s438_s3 = inlined_call_operand.vmem [shape: bf16[64,32], index: 3, kind: input, shape index: {}]   ;;  %s439_s4 = inlined_call_operand.vmem [shape: f32[1,32], index: 4, kind: input, shape index: {}]   ;;  %s440_s5 = inlined_call_operand.vmem [shape: bf16[32,8], index: 5, kind: input, shape index: {}]   ;;  %s441_s6 = inlined_call_operand.vmem [shape: f32[1,8], index: 6, kind: input, shape index: {}]   ;;  %s442_s7 = inlined_call_operand.hbm [shape: f32[8,7], index: 7, kind: output, shape index: {}]  }
   0x1   :  { %v323_v0 = vld [vmem:[%s436_s1] sm:$0xff]   ;;  %294 = vmatprep.subr.bf16.mxu0 %v356_v1  ;;  %300 = vmatprep.subr.bf16.mxu1 %v356_v1  ;;  %v324_v3 = vld [vmem:[%s438_s3 + $0x18] sm:$0xff]   ;;  %v325_v5 = vld [vmem:[%s438_s3 + $0x10] sm:$0xff]  }
   0x2   :  { %v28_v2 = vld [vmem:[%s435_s0] sm:$0xff]  ;;  %295 = vmatpush3.bf16.msra.mxu0 %v323_v0  ;;  %296 = vmatprep.mubr.msk.bf16.mxu0 %vm357_vm1, %v356_v1 }
   0x3   :  { %v29_v4 = vpack.c.bf16 %v28_v2, %v28_v2  ;;  %301 = vmatpush3.bf16.msra.mxu1 %v324_v3  ;;  %308 = vmatprep.mubr.msk.bf16.mxu1 %vm357_vm1, %v356_v1 }
   0x4   :  { %302 = vmatprep.subr.bf16.mxu1 %v356_v1  ;;  %312 = vmatprep.subr.bf16.mxu0 %v356_v1 }
   0x5   :  { %297 = vmatmul.mubr.msk.bf16.vlgmr.msra.gmra.mxu0 %vm45_vm0, %v29_v4 }
   0x6   :  { %316 = vmatprep.mubr.msk.bf16.mxu0 %vm357_vm1, %v356_v1 }
   0x7   :  { %12 = vsyncpa [#allocation3], 0  ;;  %303 = vmatpush3.bf16.msra.mxu1 %v325_v5  ;;  %v326_v6 = vld [vmem:[%s438_s3 + $0x8] sm:$0xff]   ;;  %v327_v7 = vld [vmem:[%s438_s3] sm:$0xff]   ;;  %vm130_vm2 = vcmask 523264   ;;  %vm199_vm3 = vcmask 261120  }
   0x8   :  { %304 = vmatprep.subr.bf16.mxu1 %v356_v1  ;;  %v328_v8 = vld [vmem:[%s440_s5 + $0x8] sm:$0xff]   ;;  %v271_v9 = vld [vmem:[%s437_s2] ss:$0 sm:$0xff]  ;;  %vm243_vm4 = vcmask 64512   ;;  %vm255_vm5 = vcmask 56320  }
   0x9   :  { %313 = vmatpush3.bf16.msra.mxu0 %v328_v8  ;;  %v329_v17 = vld [vmem:[%s440_s5] sm:$0xff]  }
   0xa   :  { %314 = vmatprep.subr.bf16.mxu0 %v356_v1  ;;  %v274_v18 = vld [vmem:[%s439_s4] ss:$0 sm:$0xff]  ;;  %s358_s4 = smov [#allocation2]  }
   0xb   :  { %305 = vmatpush3.bf16.msra.mxu1 %v326_v6  ;;  %v280_v26 = vld [vmem:[%s441_s6] ss:$0 sm:$0xff]  ;;  %s263_s5 = sshll.u32 %s358_s4, 4  ;;  %s264_s5 = int_to_ptr.vmem [resolvable:$true] %s263_s5 }
   0xc   :  { %306 = vmatprep.subr.bf16.mxu1 %v356_v1  ;;  %s334_s6 = scalar_lea.vmem %s264_s5, 128  ;;  %p339_p1 = scmp.lt.s32.totalorder %s264_s5, %s264_s5 }
   0xd   :  { %315 = vmatpush3.bf16.msra.mxu0 %v329_v17  ;;  %p335_p0 = scmp.ne.s32.totalorder %s264_s5, %s334_s6  ;;  %p340_p2 = scmp.lt.s32.totalorder %s334_s6, %s334_s6 }
   0xf   :  { %307 = vmatpush3.bf16.msra.mxu1 %v327_v7  ;;  %p341_p3 = por %p340_p2, %p339_p1 }
  0x11   :  { %p342_p4 = pnand %p341_p3, %p335_p0 }
  0xc5   :  { %v83_v10 = vpop.f32.mrf.mxu0 }
  0xc6   :  { %v84_v11 = vadd.f32 %v271_v9, %v83_v10 }
  0xc7   :  { %v298_v12 = vpop.f32.mrf.mxu0 }
  0xc8   :  { %v89_v13 = vmax.f32 %v84_v11, 0.0 }
  0xc9   :  { %v86_v14 = vpop.f32.mrf.mxu0 }
  0xca   :  { %v90_v15 = vpack.c.bf16 %v89_v13, %v89_v13 }
  0xcb   :  { %v299_v16 = vpop.f32.mrf.mxu0 }
  0xcc   :  { %309 = vmatmul.mubr.msk.bf16.vlgmr.msra.gmra.mxu1 %vm130_vm2, %v90_v15 }
 0x18c   :  { %v168_v19 = vpop.f32.mrf.mxu1 }
 0x18d   :  { %v169_v20 = vadd.f32 %v274_v18, %v168_v19 }
 0x18e   :  { %v310_v21 = vpop.f32.mrf.mxu1 }
 0x18f   :  { %v174_v22 = vmax.f32 %v169_v20, 0.0 }
 0x190   :  { %v171_v23 = vpop.f32.mrf.mxu1 }
 0x191   :  { %v175_v24 = vpack.c.bf16 %v174_v22, %v174_v22 }
 0x192   :  { %v311_v25 = vpop.f32.mrf.mxu1 }
 0x193   :  { %317 = vmatmul.mubr.msk.bf16.vlgmr.msra.gmra.mxu0 %vm199_vm3, %v175_v24 }
 0x253   :  { %v237_v27 = vpop.f32.mrf.mxu0 }
 0x254   :  { %v238_v28 = vadd.f32 %v280_v26, %v237_v27 }
 0x255   :  { %v318_v29 = vpop.f32.mrf.mxu0 }
 0x256   :  { %v244_v30 = vsel %vm243_vm4, %v238_v28, -inf }
 0x257   :  { %245 = vmax.xlane.f32.xlu0 %v244_v30  ;;  %v240_v31 = vpop.f32.mrf.mxu0 }
 0x259   :  { %v319_v32 = vpop.f32.mrf.mxu0 }
 0x2e0   :  { %v246_v33 = vpop.xlane.xlu0 %245 }
 0x2e1   :  { %v247_v34 = vsub.f32 %v238_v28, %v246_v33 }
 0x2e3   :  { %v248_v35 = vmul.f32 1.442695, %v247_v34 }
 0x2e5   :  { %330 = vpow2.f32 %v248_v35 }
 0x2f2   :  { %v331_v36 = vpop.eup %330 }
 0x2f3   :  { %v250_v37 = vsel %vm243_vm4, %v331_v36, 0.0 }
 0x2f4   :  { %251 = vadd.xlane.f32.xlu0 %v250_v37 }
 0x37d   :  { %v252_v38 = vpop.xlane.xlu0 %251 }
 0x37e   :  { %332 = vrcp.f32 %v252_v38 }
 0x38b   :  { %v333_v39 = vpop.eup %332 }
 0x38c   :  { %v254_v40 = vmul.f32 %v333_v39, %v331_v36 }
 0x38e   :  { %256 = vst.msk [vmem:[#allocation2] sm:$0xff] %vm255_vm5, %v254_v40 }
 0x38f   :  { %345 = shalt.err (!%p342_p4)
}
 0x390   :  { %266 = dma.vmem_to_hbm [thread:$0]  %s264_s5, 128, %s442_s7, [#allocation3]  }
 0x391   :  { %354 = dma.done.wait [#allocation3], 128  }
 0x392   :  { %355 = vsyncadd [#allocation3], 4294967168 }
 0x393   :  { %270 = vsyncpa [#allocation3], 1 }

</bundles_post_ra>
